<compile_context>
chip_gen: v5e
topology: v5e:2x2
jax: 0.10.0
libtpu: 0.0.40
codegen_flags: <defaults>
</compile_context>

<pallas_src>
import functools

import jax
import jax.numpy as jnp
from jax.experimental import pallas as pl
from jax.experimental.pallas import tpu as pltpu

_EPS = 1e-12  # matches torch F.normalize eps


def _round_up(x, m):
    return ((x + m - 1) // m) * m


def _arc_kernel(f_ref, w_ref, out_ref):
    # f_ref  : (TB, D)        raw feature tile (input dtype)
    # w_ref  : (k, TOUT, D)   pre-normalized bf16 sub-center planes for this class tile
    # out_ref: (TB, TOUT)     f32 max-over-subcenter cosine
    k, tout, d = w_ref.shape

    # L2-normalize the feature tile in f32 (rsqrt -> EUP slot, mul -> VPU).
    f = f_ref[...].astype(jnp.float32)                                   # (TB, D)
    ss = jnp.sum(f * f, axis=-1, keepdims=True)                          # (TB, 1)
    inv = jax.lax.rsqrt(jnp.maximum(ss, _EPS * _EPS))                    # 1/max(||f||, eps)
    fn = (f * inv).astype(jnp.bfloat16)                                  # bf16 MXU operand

    # One fused MXU matmul over all k sub-centers:
    # (TB, D) . (k*TOUT, D)^T -> (TB, k*TOUT), f32 accumulation.
    w = w_ref[...].reshape(k * tout, d)                                  # leading-dim collapse, layout-free
    cos_all = jax.lax.dot_general(
        fn, w, (((1,), (1,)), ((), ())),
        preferred_element_type=jnp.float32)                              # (TB, k*TOUT)

    # Max over the k contiguous, lane-aligned TOUT-wide column slices.
    best = cos_all[:, 0:tout]
    for j in range(1, k):                                                # k small & static -> unrolled
        best = jnp.maximum(best, cos_all[:, j * tout:(j + 1) * tout])

    out_ref[...] = best.astype(out_ref.dtype)


def _choose_tiles(B, D, out_features, k, feat_bytes):
    """Lane-dense tiles sized from the VMEM footprint (safe on v7x's 64 MiB)."""
    out_pad128 = _round_up(out_features, 128)
    row_align = 16 if feat_bytes == 2 else 8          # bf16 packs 16 rows / sublane tile
    tb = min(256, _round_up(B, row_align))
    tout = min(512, out_pad128)

    w_bytes = 2  # weight planes are bf16

    def footprint(tb_, tout_):
        # double-buffered input blocks + double-buffered f32 output block
        return 2 * (tb_ * D * feat_bytes + k * tout_ * D * w_bytes + tb_ * tout_ * 4)

    budget = 24 * 1024 * 1024
    while footprint(tb, tout) > budget and tout > 128:
        tout -= 128
    while footprint(tb, tout) > budget and tb > row_align:
        tb = max(row_align, tb // 2)
    return tb, tout


@functools.partial(jax.jit, static_argnames=("out_features", "k"))
def arc_margin_subcenter(features, weight, *, out_features, k):
    """features: (B, D), weight: (out_features*k, D) -> (B, out_features) f32."""
    B, D = features.shape
    Nk, D2 = weight.shape
    assert D == D2 and Nk == out_features * k

    # --- weight preprocessing: normalize once, bf16, plane layout ------------
    # NOTE: in a real model, precompute this once per weight update instead of
    # per forward call (it is a full extra pass over the weight).
    w32 = weight.astype(jnp.float32)
    w_inv = jax.lax.rsqrt(
        jnp.maximum(jnp.sum(w32 * w32, axis=1, keepdims=True), _EPS * _EPS))
    wn = (w32 * w_inv).astype(jnp.bfloat16)
    # (out*k, D) -> (k, out, D): row o*k + j of the original weight is plane j,
    # class o -- matches cosine_all.view(-1, out, k).max(dim=2).
    w_planes = wn.reshape(out_features, k, D).transpose(1, 0, 2)

    feat_bytes = jnp.dtype(features.dtype).itemsize
    TB, TOUT = _choose_tiles(B, D, out_features, k, feat_bytes)
    B_pad = _round_up(B, TB)
    OUT_pad = _round_up(out_features, TOUT)

    f_pad = jnp.pad(features, ((0, B_pad - B), (0, 0)))
    w_pad = jnp.pad(w_planes, ((0, 0), (0, OUT_pad - out_features), (0, 0)))
    # Zero-padded rows/classes produce cosine 0 and are sliced off below.

    n_out = OUT_pad // TOUT
    n_b = B_pad // TB

    cost = pl.CostEstimate(
        flops=2 * B_pad * OUT_pad * k * D,
        transcendentals=B_pad * n_out,
        bytes_accessed=int(w_pad.size * 2
                           + f_pad.size * feat_bytes * n_out
                           + B_pad * OUT_pad * 4),
    )

    out = pl.pallas_call(
        _arc_kernel,
        out_shape=jax.ShapeDtypeStruct((B_pad, OUT_pad), jnp.float32),
        grid_spec=pltpu.PrefetchScalarGridSpec(
            num_scalar_prefetch=0,
            # OUT is the outer (megacore-sharded) axis: the weight block index
            # is constant along the inner B axis, so the big weight is read
            # from HBM exactly once; only the small feature block is re-streamed.
            grid=(n_out, n_b),
            in_specs=[
                pl.BlockSpec((TB, D), lambda oi, bi: (bi, 0)),            # features
                pl.BlockSpec((k, TOUT, D), lambda oi, bi: (0, oi, 0)),    # weight planes
            ],
            out_specs=pl.BlockSpec((TB, TOUT), lambda oi, bi: (bi, oi)),
        ),
        compiler_params=pltpu.CompilerParams(
            dimension_semantics=("parallel", "arbitrary"),
            vmem_limit_bytes=48 * 1024 * 1024,
        ),
        cost_estimate=cost,
    )(f_pad, w_pad)

    return out[:B, :out_features]


def _reference(features, weight, out_features, k):
    fn = features / jnp.maximum(
        jnp.linalg.norm(features, axis=1, keepdims=True), _EPS)
    wn = weight / jnp.maximum(
        jnp.linalg.norm(weight, axis=1, keepdims=True), _EPS)
    cos_all = fn @ wn.T                                   # (B, out*k)
    cos_all = cos_all.reshape(-1, out_features, k)
    return cos_all.max(axis=2)                            # (B, out)


if __name__ == "__main__":
    key = jax.random.PRNGKey(0)
    k1, k2 = jax.random.split(key)

    B, in_features, out_features, k = 2, 32, 4, 3
    features = jax.random.normal(k1, (B, in_features), dtype=jnp.float32)
    # Mimic the module's uniform(-stdv, stdv) init.
    stdv = 1.0 / (in_features ** 0.5)
    weight = jax.random.uniform(
        k2, (out_features * k, in_features), dtype=jnp.float32,
        minval=-stdv, maxval=stdv)

    out = jax.block_until_ready(
        arc_margin_subcenter(features, weight, out_features=out_features, k=k))
    ref = _reference(features, weight, out_features, k)

    assert out.shape == (B, out_features), out.shape
    # bf16 MXU operands (f32 accumulation) -> ~1e-3 relative error on cosines;
    # tolerance loosened accordingly (flagged in the perf review).
    assert jnp.allclose(out, ref, atol=2e-2, rtol=0), "mismatch vs reference"
    print("KERNEL_OK")
</pallas_src>

<mosaic_0001>
module attributes {stable_mosaic.version = 11 : i64} {
  func.func @_arc_kernel(%arg0: i32, %arg1: i32, %arg2: memref<8x32xf32, #tpu.memory_space<vmem>>, %arg3: memref<3x128x32xbf16, #tpu.memory_space<vmem>>, %arg4: memref<8x128xf32, #tpu.memory_space<vmem>>) attributes {dimension_semantics = [#tpu.dimension_semantics<parallel>, #tpu.dimension_semantics<arbitrary>], iteration_bounds = array<i64: 1, 1>, scalar_prefetch = 0 : i64, scratch_operands = 0 : i64, tpu.core_type = #tpu.core_type<tc>, window_params = [{transform_indices = @transform_0, window_bounds = array<i64: 8, 32>}, {transform_indices = @transform_1, window_bounds = array<i64: 3, 128, 32>}, {transform_indices = @transform_2, window_bounds = array<i64: 8, 128>}]} {
    %c0 = arith.constant 0 : index
    %c0_0 = arith.constant 0 : index
    %0 = vector.load %arg2[%c0, %c0_0] : memref<8x32xf32, #tpu.memory_space<vmem>>, vector<8x32xf32>
    %1 = arith.mulf %0, %0 : vector<8x32xf32>
    %cst = arith.constant dense<0.000000e+00> : vector<8xf32>
    %2 = vector.multi_reduction <add>, %1, %cst [1] : vector<8x32xf32> to vector<8xf32>
    %3 = vector.shape_cast %2 : vector<8xf32> to vector<8x1xf32>
    %cst_1 = arith.constant 1.000000e-24 : f32
    %4 = vector.broadcast %cst_1 : f32 to vector<8x1xf32>
    %5 = arith.maximumf %3, %4 : vector<8x1xf32>
    %6 = math.rsqrt %5 : vector<8x1xf32>
    %7 = vector.broadcast %6 : vector<8x1xf32> to vector<8x32xf32>
    %8 = arith.mulf %0, %7 : vector<8x32xf32>
    %9 = arith.truncf %8 : vector<8x32xf32> to vector<8x32xbf16>
    %c0_2 = arith.constant 0 : index
    %c0_3 = arith.constant 0 : index
    %c0_4 = arith.constant 0 : index
    %10 = vector.load %arg3[%c0_2, %c0_3, %c0_4] : memref<3x128x32xbf16, #tpu.memory_space<vmem>>, vector<3x128x32xbf16>
    %11 = vector.shape_cast %10 : vector<3x128x32xbf16> to vector<384x32xbf16>
    %cst_5 = arith.constant dense<0.000000e+00> : vector<8x384xf32>
    %12 = tpu.matmul %9, %11, %cst_5 {dimension_numbers = #tpu.dot_dimension_numbers<[1], [1], [0], [0], [0, 0, 1, 0], [], []>} : vector<8x32xbf16>, vector<384x32xbf16>, vector<8x384xf32> -> vector<8x384xf32>
    %13 = vector.extract_strided_slice %12 {offsets = [0, 0], sizes = [8, 128], strides = [1, 1]} : vector<8x384xf32> to vector<8x128xf32>
    %14 = vector.extract_strided_slice %12 {offsets = [0, 128], sizes = [8, 128], strides = [1, 1]} : vector<8x384xf32> to vector<8x128xf32>
    %15 = arith.maximumf %13, %14 : vector<8x128xf32>
    %16 = vector.extract_strided_slice %12 {offsets = [0, 256], sizes = [8, 128], strides = [1, 1]} : vector<8x384xf32> to vector<8x128xf32>
    %17 = arith.maximumf %15, %16 : vector<8x128xf32>
    %c0_6 = arith.constant 0 : index
    %c0_7 = arith.constant 0 : index
    %18 = vector.load %arg4[%c0_6, %c0_7] : memref<8x128xf32, #tpu.memory_space<vmem>>, vector<8x128xf32>
    tpu.vector_store %arg4[%c0_6, %c0_7], %17 {strides = array<i32>} : memref<8x128xf32, #tpu.memory_space<vmem>>, vector<8x128xf32>,
    return
  }
  func.func @transform_0(%arg0: i32, %arg1: i32) -> (i32, i32) {
    %c0_i32 = arith.constant 0 : i32
    %c0_i32_0 = arith.constant 0 : i32
    return %arg1, %c0_i32 : i32, i32
  }
  func.func @transform_1(%arg0: i32, %arg1: i32) -> (i32, i32, i32) {
    %c0_i32 = arith.constant 0 : i32
    %c0_i32_0 = arith.constant 0 : i32
    %c0_i32_1 = arith.constant 0 : i32
    return %c0_i32, %arg0, %c0_i32_0 : i32, i32, i32
  }
  func.func @transform_2(%arg0: i32, %arg1: i32) -> (i32, i32) {
    %c0_i32 = arith.constant 0 : i32
    return %arg1, %arg0 : i32, i32
  }
}

</mosaic_0001>

<bundles_post_ra>
// kernel: arc_margin_subcenter.1
= control target key start
LH: loop header
LB: loop body
LE: loop exit
PB: predicated region body
PF: predicated region fallthrough
CT: control target
= control target key end

     0   :  { %vm13_vm0 = vcmask 261120   ;;  %s570_s0 = inlined_call_operand.vmem [shape: f32[8,32], index: 0, kind: input, shape index: {}]   ;;  %s571_s1 = inlined_call_operand.vmem [shape: bf16[3,128,32], index: 1, kind: input, shape index: {}]   ;;  %s572_s2 = inlined_call_operand.vmem [shape: f32[8,128], index: 2, kind: output, shape index: {}]  }
   0x1   :  { %v462_v0 = vld [vmem:[%s570_s0] sm:$0xff]  ;;  %v425_v1 = vld [vmem:[%s571_s1 + $0x38] sm:$0xff]  ;;  %v424_v9 = vld [vmem:[%s571_s1 + $0x30] sm:$0xff] }
   0x2   :  { %v433_v2 = vld [vmem:[%s571_s1 + $0x78] sm:$0xff]  ;;  %v12_v3 = vmul.f32 %v462_v0, %v462_v0  ;;  %v223_v5 = vsel %vm13_vm0, %v425_v1, 0  ;;  %v432_v10 = vld [vmem:[%s571_s1 + $0x70] sm:$0xff]  ;;  %v220_v12 = vsel %vm13_vm0, %v424_v9, 0  ;;  %v423_v15 = vld [vmem:[%s571_s1 + $0x28] sm:$0xff] }
   0x3   :  { %v441_v4 = vld [vmem:[%s571_s1 + $0xb8] sm:$0xff]  ;;  %v247_v6 = vsel %vm13_vm0, %v433_v2, 0  ;;  %273 = vmatpush.bf16.xpose.msra.mxu0 %v223_v5  ;;  %v440_v11 = vld [vmem:[%s571_s1 + $0xb0] sm:$0xff]  ;;  %v244_v13 = vsel %vm13_vm0, %v432_v10, 0  ;;  %v431_v16 = vld [vmem:[%s571_s1 + $0x68] sm:$0xff]  ;;  %v217_v18 = vsel %vm13_vm0, %v423_v15, 0 }
   0x4   :  { %v14_v7 = vsel %vm13_vm0, %v12_v3, 0.0  ;;  %286 = vmatpush.bf16.xpose.msra.mxu1 %v247_v6  ;;  %v271_v8 = vsel %vm13_vm0, %v441_v4, 0  ;;  %v268_v14 = vsel %vm13_vm0, %v440_v11, 0  ;;  %v439_v17 = vld [vmem:[%s571_s1 + $0xa8] sm:$0xff]  ;;  %v241_v19 = vsel %vm13_vm0, %v431_v16, 0  ;;  %v422_v21 = vld [vmem:[%s571_s1 + $0x20] sm:$0xff] }
   0x5   :  { %15 = vadd.xlane.f32.xlu0 %v14_v7  ;;  %299 = vmatpush.bf16.xpose.msra.mxu2 %v271_v8  ;;  %v265_v20 = vsel %vm13_vm0, %v439_v17, 0  ;;  %v430_v22 = vld [vmem:[%s571_s1 + $0x60] sm:$0xff]  ;;  %v214_v24 = vsel %vm13_vm0, %v422_v21, 0  ;;  %v421_v27 = vld [vmem:[%s571_s1 + $0x18] sm:$0xff]  ;;  %v420_v33 = vld [vmem:[%s571_s1 + $0x10] sm:$0xff] }
   0x6   :  { %v438_v23 = vld [vmem:[%s571_s1 + $0xa0] sm:$0xff]  ;;  %v238_v25 = vsel %vm13_vm0, %v430_v22, 0  ;;  %v429_v28 = vld [vmem:[%s571_s1 + $0x58] sm:$0xff]  ;;  %v211_v30 = vsel %vm13_vm0, %v421_v27, 0  ;;  %v428_v34 = vld [vmem:[%s571_s1 + $0x50] sm:$0xff]  ;;  %v208_v36 = vsel %vm13_vm0, %v420_v33, 0 }
   0x7   :  { %v262_v26 = vsel %vm13_vm0, %v438_v23, 0  ;;  %v437_v29 = vld [vmem:[%s571_s1 + $0x98] sm:$0xff]  ;;  %v235_v31 = vsel %vm13_vm0, %v429_v28, 0  ;;  %v436_v35 = vld [vmem:[%s571_s1 + $0x90] sm:$0xff]  ;;  %v232_v37 = vsel %vm13_vm0, %v428_v34, 0  ;;  %v419_v39 = vld [vmem:[%s571_s1 + $0x8] sm:$0xff] }
   0x8   :  { %v259_v32 = vsel %vm13_vm0, %v437_v29, 0  ;;  %v256_v38 = vsel %vm13_vm0, %v436_v35, 0  ;;  %v427_v40 = vld [vmem:[%s571_s1 + $0x48] sm:$0xff]  ;;  %v205_v42 = vsel %vm13_vm0, %v419_v39, 0  ;;  %v418_v45 = vld [vmem:[%s571_s1] sm:$0xff] }
   0x9   :  { %v435_v41 = vld [vmem:[%s571_s1 + $0x88] sm:$0xff]  ;;  %v229_v43 = vsel %vm13_vm0, %v427_v40, 0  ;;  %v426_v46 = vld [vmem:[%s571_s1 + $0x40] sm:$0xff]  ;;  %v202_v48 = vsel %vm13_vm0, %v418_v45, 0 }
   0xa   :  { %v253_v44 = vsel %vm13_vm0, %v435_v41, 0  ;;  %v434_v47 = vld [vmem:[%s571_s1 + $0x80] sm:$0xff]  ;;  %v226_v49 = vsel %vm13_vm0, %v426_v46, 0 }
   0xb   :  { %274 = vmatpush.bf16.xpose.msra.mxu0 %v220_v12  ;;  %v250_v50 = vsel %vm13_vm0, %v434_v47, 0 }
   0xc   :  { %287 = vmatpush.bf16.xpose.msra.mxu1 %v244_v13 }
   0xd   :  { %300 = vmatpush.bf16.xpose.msra.mxu2 %v268_v14 }
  0x13   :  { %275 = vmatpush.bf16.xpose.msra.mxu0 %v217_v18 }
  0x14   :  { %288 = vmatpush.bf16.xpose.msra.mxu1 %v241_v19 }
  0x15   :  { %301 = vmatpush.bf16.xpose.msra.mxu2 %v265_v20 }
  0x1b   :  { %276 = vmatpush.bf16.xpose.msra.mxu0 %v214_v24 }
  0x1c   :  { %289 = vmatpush.bf16.xpose.msra.mxu1 %v238_v25 }
  0x1d   :  { %302 = vmatpush.bf16.xpose.msra.mxu2 %v262_v26 }
  0x23   :  { %277 = vmatpush.bf16.xpose.msra.mxu0 %v211_v30 }
  0x24   :  { %290 = vmatpush.bf16.xpose.msra.mxu1 %v235_v31 }
  0x25   :  { %303 = vmatpush.bf16.xpose.msra.mxu2 %v259_v32 }
  0x2b   :  { %278 = vmatpush.bf16.xpose.msra.mxu0 %v208_v36 }
  0x2c   :  { %291 = vmatpush.bf16.xpose.msra.mxu1 %v232_v37 }
  0x2d   :  { %304 = vmatpush.bf16.xpose.msra.mxu2 %v256_v38 }
  0x33   :  { %279 = vmatpush.bf16.xpose.msra.mxu0 %v205_v42 }
  0x34   :  { %292 = vmatpush.bf16.xpose.msra.mxu1 %v229_v43 }
  0x35   :  { %305 = vmatpush.bf16.xpose.msra.mxu2 %v253_v44 }
  0x3b   :  { %280 = vmatpush.bf16.xpose.msra.mxu0 %v202_v48 }
  0x3c   :  { %293 = vmatpush.bf16.xpose.msra.mxu1 %v226_v49 }
  0x3d   :  { %306 = vmatpush.bf16.xpose.msra.mxu2 %v250_v50 }
  0x78   :  { %v16_v51 = vpop.xlane.xlu0 %15 }
  0x79   :  { %v17_v52 = vmax.f32 %v16_v51, 1e-24 }
  0x7b   :  { %442 = vrsqrt.f32 %v17_v52  ;;  %vm24_vm2 = vweird.f32 %v17_v52 }
  0x81   :  { %v443_v53 = vpop.eup %442 }
  0x82   :  { %v19_v54 = vmul.f32 %v443_v53, %v17_v52  ;;  %vm25_vm1 = vweird.f32 %v443_v53 }
  0x83   :  { %vm26_vm3 = vmor %vm24_vm2, %vm25_vm1 }
  0x84   :  { %v20_v55 = vmul.f32 %v443_v53, %v19_v54 }
  0x86   :  { %v21_v56 = vmul.f32 0.5, %v20_v55 }
  0x88   :  { %v22_v57 = vsub.f32 1.5, %v21_v56 }
  0x8a   :  { %v23_v58 = vmul.f32 %v443_v53, %v22_v57 }
  0x8c   :  { %v27_v59 = vsel %vm26_vm3, %v443_v53, %v23_v58 }
  0x8d   :  { %v28_v60 = vmul.f32 %v27_v59, %v462_v0 }
  0x8f   :  { %v29_v61 = vpack.c.bf16 %v28_v60, %v28_v60 }
  0x91   :  { %415 = vmatmul.msk.bf16.vlgmr.msra.gmra.mxu0 %vm13_vm0, %v29_v61  ;;  %416 = vmatmul.msk.bf16.vlgmr.msra.gmra.mxu1 %vm13_vm0, %v29_v61 }
  0x92   :  { %417 = vmatmul.msk.bf16.vlgmr.msra.gmra.mxu2 %vm13_vm0, %v29_v61 }
 0x10e   :  { %v282_v62 = vpop.f32.mrf.mxu0  ;;  %v295_v63 = vpop.f32.mrf.mxu1 }
 0x10f   :  { %v312_v1 = vmax.f32 %v282_v62, %v295_v63 }
 0x115   :  { %v308_v2 = vpop.f32.mrf.mxu2 }
 0x116   :  { %v313_v3 = vmax.f32 %v312_v1, %v308_v2  ;;  %v284_v4 = vpop.f32.mrf.mxu0  ;;  %v297_v5 = vpop.f32.mrf.mxu1 }
 0x118   :  { %314 = vst [vmem:[%s572_s2] sm:$0xff] %v313_v3 }
 0x11d   :  { %v310_v6 = vpop.f32.mrf.mxu2 }

</bundles_post_ra>
